<compile_context>
chip_gen: v7x
topology: tpu7x:2x2x1
jax: 0.10.0
libtpu: 0.0.40
codegen_flags: <defaults>
</compile_context>

<pallas_src>
import functools

import jax
import jax.numpy as jnp
from jax.experimental import pallas as pl
from jax.experimental.pallas import tpu as pltpu

IN_FEATURES = 16      # stands in for X_train.shape[1]
H1, H2, H3 = 200, 100, 100
NUM_CLASSES = 4       # stands in for y_train.unique().shape[0]

LANE = 128
MIN_TB = 16           # bf16 sublane packing -> minimum row tile of 16
TB_MAX = 2048         # large-batch row tile; fits default scoped VMEM easily


def _round_up(v, m):
    return ((v + m - 1) // m) * m


# Padded (lane-dense) dims used inside the kernel.
H1_P = _round_up(H1, LANE)            # 256
H2_P = _round_up(H2, LANE)            # 128
H3_P = _round_up(H3, LANE)            # 128
OUT_P = _round_up(NUM_CLASSES, LANE)  # 128


def mlp_kernel(x_ref,
               w1_ref, b1_ref,
               w2_ref, b2_ref,
               w3_ref, b3_ref,
               w4_ref, b4_ref,
               o_ref):
    """One batch tile: 4 fused GEMMs + bias + ReLU, all on-chip.

    x arrives as f32 and is cast to bf16 here (no separate XLA cast pass);
    MXU operands are bf16, accumulation / bias add / ReLU stay in f32, and
    the final store is bf16 (halves the output HBM stream).
    """
    x = x_ref[...].astype(jnp.bfloat16)
    # Layer 1: Linear + ReLU
    h = jnp.dot(x, w1_ref[...], preferred_element_type=jnp.float32)
    h = jnp.maximum(h + b1_ref[...], 0.0)
    # Layer 2: Linear + ReLU
    h = jnp.dot(h.astype(jnp.bfloat16), w2_ref[...],
                preferred_element_type=jnp.float32)
    h = jnp.maximum(h + b2_ref[...], 0.0)
    # Layer 3: Linear + ReLU
    h = jnp.dot(h.astype(jnp.bfloat16), w3_ref[...],
                preferred_element_type=jnp.float32)
    h = jnp.maximum(h + b3_ref[...], 0.0)
    # Layer 4: Linear (logits, no activation); lane-dense bf16 store.
    logits = jnp.dot(h.astype(jnp.bfloat16), w4_ref[...],
                     preferred_element_type=jnp.float32)
    o_ref[...] = (logits + b4_ref[...]).astype(o_ref.dtype)


def prepare_params(params_f32):
    """Pad weights/biases to lane-dense shapes and cast weights to bf16.

    params_f32: list of (W [in, out] f32, b [1, out] f32) with the original
    (unpadded) shapes. Padded rows/columns are zero, so the forward result on
    the first NUM_CLASSES logits is unchanged.
    """
    (w1, b1), (w2, b2), (w3, b3), (w4, b4) = params_f32

    def pad_w(w, in_p, out_p):
        fi, fo = w.shape
        w = jnp.pad(w, ((0, in_p - fi), (0, out_p - fo)))
        return w.astype(jnp.bfloat16)

    def pad_b(b, out_p):
        return jnp.pad(b, ((0, 0), (0, out_p - b.shape[1]))).astype(jnp.float32)

    return (
        (pad_w(w1, IN_FEATURES, H1_P), pad_b(b1, H1_P)),
        (pad_w(w2, H1_P, H2_P),        pad_b(b2, H2_P)),
        (pad_w(w3, H2_P, H3_P),        pad_b(b3, H3_P)),
        (pad_w(w4, H3_P, OUT_P),       pad_b(b4, OUT_P)),
    )


@functools.partial(jax.jit, static_argnames=("tb",))
def _ann_forward_padded(x_pad, padded_params, tb):
    """x_pad: [padded_batch, IN_FEATURES] f32, padded_batch % tb == 0."""
    (w1, b1), (w2, b2), (w3, b3), (w4, b4) = padded_params
    padded_batch = x_pad.shape[0]
    n_tiles = padded_batch // tb

    def resident(shape):
        # Weights/biases: same block for every grid step -> DMA'd exactly once
        # and kept resident in VMEM across the whole grid.
        return pl.BlockSpec(shape, lambda i: (0, 0))

    in_specs = [
        pl.BlockSpec((tb, IN_FEATURES), lambda i: (i, 0)),   # x tile, pipelined
        resident(w1.shape), resident(b1.shape),
        resident(w2.shape), resident(b2.shape),
        resident(w3.shape), resident(b3.shape),
        resident(w4.shape), resident(b4.shape),
    ]
    out_spec = pl.BlockSpec((tb, OUT_P), lambda i: (i, 0))

    flops = 2 * padded_batch * (IN_FEATURES * H1_P + H1_P * H2_P
                                + H2_P * H3_P + H3_P * OUT_P)
    bytes_accessed = (
        x_pad.size * x_pad.dtype.itemsize
        + sum(int(a.size) * a.dtype.itemsize
              for pair in padded_params for a in pair)
        + padded_batch * OUT_P * 2           # bf16 logits writeback
    )

    return pl.pallas_call(
        mlp_kernel,
        out_shape=jax.ShapeDtypeStruct((padded_batch, OUT_P), jnp.bfloat16),
        grid=(n_tiles,),
        in_specs=in_specs,
        out_specs=out_spec,
        compiler_params=pltpu.CompilerParams(
            dimension_semantics=("parallel",)),
        cost_estimate=pl.CostEstimate(flops=flops,
                                      transcendentals=0,
                                      bytes_accessed=bytes_accessed),
    )(x_pad, w1, b1, w2, b2, w3, b3, w4, b4)


def _pick_tb(batch):
    """Row tile: >= 2 grid steps whenever possible (v7x dual-TC sharding),
    capped at TB_MAX to amortise per-step overhead, floored at 16 rows."""
    half = _round_up(pl.cdiv(max(batch, 1), 2), MIN_TB)
    return max(MIN_TB, min(TB_MAX, half))


def ann_forward_padded(x, padded_params):
    """x: [batch, IN_FEATURES] f32 -> [padded_batch, OUT_P] bf16 logits.

    Perf-critical consumers (argmax / cross-entropy) should consume this
    padded bf16 output directly instead of slicing it first.
    """
    batch = x.shape[0]
    tb = _pick_tb(batch)
    padded_batch = _round_up(batch, tb)
    if padded_batch != batch:
        x = jnp.pad(x, ((0, padded_batch - batch), (0, 0)))
    return _ann_forward_padded(x, padded_params, tb)


def ann_forward(x, padded_params):
    """x: [batch, IN_FEATURES] f32 -> [batch, NUM_CLASSES] f32 logits
    (matches the PyTorch module's forward signature)."""
    out = ann_forward_padded(x, padded_params)
    # NOTE: this slice/upcast is a small separate pass over the (now bf16,
    # half-size) padded logits; skip it by using ann_forward_padded directly.
    return out[:x.shape[0], :NUM_CLASSES].astype(jnp.float32)


def init_params(key):
    """Deterministic synthetic init matching the PyTorch layer shapes.
    PyTorch Linear stores W as [out, in]; we store the transpose [in, out]."""
    dims = [(IN_FEATURES, H1), (H1, H2), (H2, H3), (H3, NUM_CLASSES)]
    params = []
    for (fan_in, fan_out) in dims:
        key, kw, kb = jax.random.split(key, 3)
        bound = 1.0 / jnp.sqrt(fan_in)
        w = jax.random.uniform(kw, (fan_in, fan_out), jnp.float32, -bound, bound)
        b = jax.random.uniform(kb, (1, fan_out), jnp.float32, -bound, bound)
        params.append((w, b))
    return params


def reference_forward(x, params_f32):
    """Mirrors the kernel numerics (bf16 MXU operands, f32 accumulate,
    bf16 final store)."""
    h = x
    for i, (w, b) in enumerate(params_f32):
        h = jnp.dot(h.astype(jnp.bfloat16), w.astype(jnp.bfloat16),
                    preferred_element_type=jnp.float32) + b
        if i < len(params_f32) - 1:
            h = jnp.maximum(h, 0.0)
    return h.astype(jnp.bfloat16).astype(jnp.float32)


if __name__ == "__main__":
    key = jax.random.PRNGKey(0)
    params_f32 = init_params(key)
    padded_params = prepare_params(params_f32)

    # Small single-tile run.
    key, kx = jax.random.split(key)
    batch = 8
    x = jax.random.normal(kx, (batch, IN_FEATURES), jnp.float32)
    out = ann_forward(x, padded_params)
    jax.block_until_ready(out)
    ref = reference_forward(x, params_f32)
    assert out.shape == (batch, NUM_CLASSES)
    assert jnp.allclose(out, ref, atol=2e-2, rtol=2e-2)

    # Multi-tile + batch-padding path (still small).
    key, kx2 = jax.random.split(key)
    batch2 = 300
    x2 = jax.random.normal(kx2, (batch2, IN_FEATURES), jnp.float32)
    out2 = ann_forward(x2, padded_params)
    jax.block_until_ready(out2)
    ref2 = reference_forward(x2, params_f32)
    assert out2.shape == (batch2, NUM_CLASSES)
    assert jnp.allclose(out2, ref2, atol=2e-2, rtol=2e-2)

    print("KERNEL_OK")
</pallas_src>

<mosaic_0001>
module attributes {stable_mosaic.version = 11 : i64} {
  func.func @mlp_kernel(%arg0: i32, %arg1: memref<16x16xf32, #tpu.memory_space<vmem>>, %arg2: memref<16x256xbf16, #tpu.memory_space<vmem>>, %arg3: memref<1x256xf32, #tpu.memory_space<vmem>>, %arg4: memref<256x128xbf16, #tpu.memory_space<vmem>>, %arg5: memref<1x128xf32, #tpu.memory_space<vmem>>, %arg6: memref<128x128xbf16, #tpu.memory_space<vmem>>, %arg7: memref<1x128xf32, #tpu.memory_space<vmem>>, %arg8: memref<128x128xbf16, #tpu.memory_space<vmem>>, %arg9: memref<1x128xf32, #tpu.memory_space<vmem>>, %arg10: memref<16x128xbf16, #tpu.memory_space<vmem>>) attributes {dimension_semantics = [#tpu.dimension_semantics<parallel>], iteration_bounds = array<i64: 1>, scalar_prefetch = 0 : i64, scratch_operands = 0 : i64, tpu.core_type = #tpu.core_type<tc>, window_params = [{transform_indices = @transform_0, window_bounds = array<i64: 16, 16>}, {pipeline_mode = #tpu.pipeline_mode<synchronous>, transform_indices = @transform_1, window_bounds = array<i64: 16, 256>}, {pipeline_mode = #tpu.pipeline_mode<synchronous>, transform_indices = @transform_2, window_bounds = array<i64: 1, 256>}, {pipeline_mode = #tpu.pipeline_mode<synchronous>, transform_indices = @transform_3, window_bounds = array<i64: 256, 128>}, {pipeline_mode = #tpu.pipeline_mode<synchronous>, transform_indices = @transform_4, window_bounds = array<i64: 1, 128>}, {pipeline_mode = #tpu.pipeline_mode<synchronous>, transform_indices = @transform_5, window_bounds = array<i64: 128, 128>}, {pipeline_mode = #tpu.pipeline_mode<synchronous>, transform_indices = @transform_6, window_bounds = array<i64: 1, 128>}, {pipeline_mode = #tpu.pipeline_mode<synchronous>, transform_indices = @transform_7, window_bounds = array<i64: 128, 128>}, {pipeline_mode = #tpu.pipeline_mode<synchronous>, transform_indices = @transform_8, window_bounds = array<i64: 1, 128>}, {transform_indices = @transform_9, window_bounds = array<i64: 16, 128>}]} {
    %c0 = arith.constant 0 : index
    %c0_0 = arith.constant 0 : index
    %0 = vector.load %arg1[%c0, %c0_0] : memref<16x16xf32, #tpu.memory_space<vmem>>, vector<16x16xf32>
    %1 = arith.truncf %0 : vector<16x16xf32> to vector<16x16xbf16>
    %c0_1 = arith.constant 0 : index
    %c0_2 = arith.constant 0 : index
    %2 = vector.load %arg2[%c0_1, %c0_2] : memref<16x256xbf16, #tpu.memory_space<vmem>>, vector<16x256xbf16>
    %cst = arith.constant dense<0.000000e+00> : vector<16x256xf32>
    %3 = tpu.matmul %1, %2, %cst {dimension_numbers = #tpu.dot_dimension_numbers<[1], [0], [0], [1], [0, 0, 1, 1], [], []>} : vector<16x16xbf16>, vector<16x256xbf16>, vector<16x256xf32> -> vector<16x256xf32>
    %c0_3 = arith.constant 0 : index
    %c0_4 = arith.constant 0 : index
    %4 = vector.load %arg3[%c0_3, %c0_4] : memref<1x256xf32, #tpu.memory_space<vmem>>, vector<1x256xf32>
    %5 = vector.broadcast %4 : vector<1x256xf32> to vector<16x256xf32>
    %6 = arith.addf %3, %5 : vector<16x256xf32>
    %cst_5 = arith.constant 0.000000e+00 : f32
    %7 = vector.broadcast %cst_5 : f32 to vector<16x256xf32>
    %8 = arith.maximumf %6, %7 : vector<16x256xf32>
    %9 = arith.truncf %8 : vector<16x256xf32> to vector<16x256xbf16>
    %c0_6 = arith.constant 0 : index
    %c0_7 = arith.constant 0 : index
    %10 = vector.load %arg4[%c0_6, %c0_7] : memref<256x128xbf16, #tpu.memory_space<vmem>>, vector<256x128xbf16>
    %cst_8 = arith.constant dense<0.000000e+00> : vector<16x128xf32>
    %11 = tpu.matmul %9, %10, %cst_8 {dimension_numbers = #tpu.dot_dimension_numbers<[1], [0], [0], [1], [0, 0, 1, 1], [], []>} : vector<16x256xbf16>, vector<256x128xbf16>, vector<16x128xf32> -> vector<16x128xf32>
    %c0_9 = arith.constant 0 : index
    %c0_10 = arith.constant 0 : index
    %12 = vector.load %arg5[%c0_9, %c0_10] : memref<1x128xf32, #tpu.memory_space<vmem>>, vector<1x128xf32>
    %13 = vector.broadcast %12 : vector<1x128xf32> to vector<16x128xf32>
    %14 = arith.addf %11, %13 : vector<16x128xf32>
    %cst_11 = arith.constant 0.000000e+00 : f32
    %15 = vector.broadcast %cst_11 : f32 to vector<16x128xf32>
    %16 = arith.maximumf %14, %15 : vector<16x128xf32>
    %17 = arith.truncf %16 : vector<16x128xf32> to vector<16x128xbf16>
    %c0_12 = arith.constant 0 : index
    %c0_13 = arith.constant 0 : index
    %18 = vector.load %arg6[%c0_12, %c0_13] : memref<128x128xbf16, #tpu.memory_space<vmem>>, vector<128x128xbf16>
    %cst_14 = arith.constant dense<0.000000e+00> : vector<16x128xf32>
    %19 = tpu.matmul %17, %18, %cst_14 {dimension_numbers = #tpu.dot_dimension_numbers<[1], [0], [0], [1], [0, 0, 1, 1], [], []>} : vector<16x128xbf16>, vector<128x128xbf16>, vector<16x128xf32> -> vector<16x128xf32>
    %c0_15 = arith.constant 0 : index
    %c0_16 = arith.constant 0 : index
    %20 = vector.load %arg7[%c0_15, %c0_16] : memref<1x128xf32, #tpu.memory_space<vmem>>, vector<1x128xf32>
    %21 = vector.broadcast %20 : vector<1x128xf32> to vector<16x128xf32>
    %22 = arith.addf %19, %21 : vector<16x128xf32>
    %cst_17 = arith.constant 0.000000e+00 : f32
    %23 = vector.broadcast %cst_17 : f32 to vector<16x128xf32>
    %24 = arith.maximumf %22, %23 : vector<16x128xf32>
    %25 = arith.truncf %24 : vector<16x128xf32> to vector<16x128xbf16>
    %c0_18 = arith.constant 0 : index
    %c0_19 = arith.constant 0 : index
    %26 = vector.load %arg8[%c0_18, %c0_19] : memref<128x128xbf16, #tpu.memory_space<vmem>>, vector<128x128xbf16>
    %cst_20 = arith.constant dense<0.000000e+00> : vector<16x128xf32>
    %27 = tpu.matmul %25, %26, %cst_20 {dimension_numbers = #tpu.dot_dimension_numbers<[1], [0], [0], [1], [0, 0, 1, 1], [], []>} : vector<16x128xbf16>, vector<128x128xbf16>, vector<16x128xf32> -> vector<16x128xf32>
    %c0_21 = arith.constant 0 : index
    %c0_22 = arith.constant 0 : index
    %28 = vector.load %arg9[%c0_21, %c0_22] : memref<1x128xf32, #tpu.memory_space<vmem>>, vector<1x128xf32>
    %29 = vector.broadcast %28 : vector<1x128xf32> to vector<16x128xf32>
    %30 = arith.addf %27, %29 : vector<16x128xf32>
    %31 = arith.truncf %30 : vector<16x128xf32> to vector<16x128xbf16>
    %c0_23 = arith.constant 0 : index
    %c0_24 = arith.constant 0 : index
    %32 = vector.load %arg10[%c0_23, %c0_24] : memref<16x128xbf16, #tpu.memory_space<vmem>>, vector<16x128xbf16>
    tpu.vector_store %arg10[%c0_23, %c0_24], %31 {strides = array<i32>} : memref<16x128xbf16, #tpu.memory_space<vmem>>, vector<16x128xbf16>,
    return
  }
  func.func @transform_0(%arg0: i32) -> (i32, i32) {
    %c0_i32 = arith.constant 0 : i32
    %c0_i32_0 = arith.constant 0 : i32
    return %arg0, %c0_i32 : i32, i32
  }
  func.func @transform_1(%arg0: i32) -> (i32, i32) {
    %c0_i32 = arith.constant 0 : i32
    %c0_i32_0 = arith.constant 0 : i32
    %c0_i32_1 = arith.constant 0 : i32
    return %c0_i32, %c0_i32_0 : i32, i32
  }
  func.func @transform_2(%arg0: i32) -> (i32, i32) {
    %c0_i32 = arith.constant 0 : i32
    %c0_i32_0 = arith.constant 0 : i32
    %c0_i32_1 = arith.constant 0 : i32
    return %c0_i32, %c0_i32_0 : i32, i32
  }
  func.func @transform_3(%arg0: i32) -> (i32, i32) {
    %c0_i32 = arith.constant 0 : i32
    %c0_i32_0 = arith.constant 0 : i32
    %c0_i32_1 = arith.constant 0 : i32
    return %c0_i32, %c0_i32_0 : i32, i32
  }
  func.func @transform_4(%arg0: i32) -> (i32, i32) {
    %c0_i32 = arith.constant 0 : i32
    %c0_i32_0 = arith.constant 0 : i32
    %c0_i32_1 = arith.constant 0 : i32
    return %c0_i32, %c0_i32_0 : i32, i32
  }
  func.func @transform_5(%arg0: i32) -> (i32, i32) {
    %c0_i32 = arith.constant 0 : i32
    %c0_i32_0 = arith.constant 0 : i32
    %c0_i32_1 = arith.constant 0 : i32
    return %c0_i32, %c0_i32_0 : i32, i32
  }
  func.func @transform_6(%arg0: i32) -> (i32, i32) {
    %c0_i32 = arith.constant 0 : i32
    %c0_i32_0 = arith.constant 0 : i32
    %c0_i32_1 = arith.constant 0 : i32
    return %c0_i32, %c0_i32_0 : i32, i32
  }
  func.func @transform_7(%arg0: i32) -> (i32, i32) {
    %c0_i32 = arith.constant 0 : i32
    %c0_i32_0 = arith.constant 0 : i32
    %c0_i32_1 = arith.constant 0 : i32
    return %c0_i32, %c0_i32_0 : i32, i32
  }
  func.func @transform_8(%arg0: i32) -> (i32, i32) {
    %c0_i32 = arith.constant 0 : i32
    %c0_i32_0 = arith.constant 0 : i32
    %c0_i32_1 = arith.constant 0 : i32
    return %c0_i32, %c0_i32_0 : i32, i32
  }
  func.func @transform_9(%arg0: i32) -> (i32, i32) {
    %c0_i32 = arith.constant 0 : i32
    %c0_i32_0 = arith.constant 0 : i32
    return %arg0, %c0_i32 : i32, i32
  }
}

</mosaic_0001>

<bundles_post_ra>
// kernel: _ann_forward_padded.1
= control target key start
LH: loop header
LB: loop body
LE: loop exit
PB: predicated region body
PF: predicated region fallthrough
CT: control target
= control target key end

     0   :  { %14 = vsyncpa [#allocation3], 0  ;;  %s1115_s0 = inlined_call_operand.hbm [shape: f32[16,16], index: 0, kind: input, shape index: {}]   ;;  %s1116_s1 = inlined_call_operand.hbm [shape: bf16[16,256], index: 1, kind: input, shape index: {}]   ;;  %s1117_s2 = inlined_call_operand.vmem [shape: f32[1,256], index: 2, kind: input, shape index: {}]   ;;  %s1118_s3 = inlined_call_operand.hbm [shape: bf16[256,128], index: 3, kind: input, shape index: {}]   ;;  %s1119_s4 = inlined_call_operand.vmem [shape: f32[1,128], index: 4, kind: input, shape index: {}]   ;;  %s1120_s5 = inlined_call_operand.hbm [shape: bf16[128,128], index: 5, kind: input, shape index: {}]   ;;  %s1121_s6 = inlined_call_operand.vmem [shape: f32[1,128], index: 6, kind: input, shape index: {}]   ;;  %s1122_s7 = inlined_call_operand.hbm [shape: bf16[128,128], index: 7, kind: input, shape index: {}]   ;;  %s1123_s8 = inlined_call_operand.vmem [shape: f32[1,128], index: 8, kind: input, shape index: {}]   ;;  %s1124_s9 = inlined_call_operand.hbm [shape: bf16[16,128], index: 9, kind: output, shape index: {}]  }
   0x1   :  { %15 = vsyncpa [#allocation6], 0 }
   0x2   :  { %16 = vsyncpa [#allocation9], 0 }
   0x3   :  { %17 = vsyncpa [#allocation4], 0  ;;  %s932_s30 = smov [#allocation5]   ;;  %s792_s13 = scalar_lea.hbm %s1116_s1, 256 }
   0x4   :  { %s35_s10 = sshll.u32 %s932_s30, 4  ;;  %p793_p0 = scmp.ne.s32.totalorder %s1116_s1, %s792_s13  ;;  %s36_s10 = int_to_ptr.vmem [resolvable:$true] %s35_s10 }
   0x5   :  { %p796_p1 = scmp.lt.u32.totalorder %s792_s13, %s1116_s1 }
   0x7   :  { %p798_p2 = pnand %p796_p1, %p793_p0 }
   0x9   :  { %801 = shalt.err (!%p798_p2)
}
   0xa   :  { %s802_s18 = scalar_lea.vmem %s36_s10, 256  ;;  %p807_p4 = scmp.lt.s32.totalorder %s36_s10, %s36_s10 }
   0xb   :  { %p803_p3 = scmp.ne.s32.totalorder %s36_s10, %s802_s18  ;;  %p808_p5 = scmp.lt.s32.totalorder %s802_s18, %s802_s18 }
   0xd   :  { %p809_p6 = por %p808_p5, %p807_p4 }
   0xf   :  { %p810_p7 = pnand %p809_p6, %p803_p3 }
  0x11   :  { %813 = shalt.err (!%p810_p7)
}
  0x12   :  { %s933_s19 = smov 128   ;;  %s934_s20 = smov 8  }
  0x13   :  { %41 = dma.hbm_to_vmem [thread:$0]  %s1116_s1, 256, %s36_s10, [#allocation6], %s933_s19, %s933_s19, %s934_s20  }
  0x14   :  { %s935_s23 = smov [#allocation8]   ;;  %s936_s25 = smov [#allocation2]  }
  0x15   :  { %s63_s24 = sshll.u32 %s935_s23, 4  ;;  %s23_s26 = sshll.u32 %s936_s25, 4  ;;  %s64_s24 = int_to_ptr.vmem [resolvable:$true] %s63_s24  ;;  %s24_s26 = int_to_ptr.vmem [resolvable:$true] %s23_s26 }
  0x16   :  { %s814_s29 = scalar_lea.hbm %s1120_s5, 1024 }
  0x17   :  { %p815_p8 = scmp.ne.s32.totalorder %s1120_s5, %s814_s29  ;;  %p818_p9 = scmp.lt.u32.totalorder %s814_s29, %s1120_s5 }
  0x19   :  { %p820_p10 = pnand %p818_p9, %p815_p8 }
  0x1b   :  { %823 = shalt.err (!%p820_p10)
}
  0x1c   :  { %s824_s1 = scalar_lea.vmem %s64_s24, 1024  ;;  %p829_p12 = scmp.lt.s32.totalorder %s64_s24, %s64_s24 }
  0x1d   :  { %p825_p11 = scmp.ne.s32.totalorder %s64_s24, %s824_s1  ;;  %p830_p13 = scmp.lt.s32.totalorder %s824_s1, %s824_s1 }
  0x1f   :  { %p831_p0 = por %p830_p13, %p829_p12 }
  0x21   :  { %p832_p1 = pnand %p831_p0, %p825_p11 }
  0x23   :  { %835 = shalt.err (!%p832_p1)
}
  0x24   :  { %s937_s10 = smov 64   ;;  %s938_s14 = smov 4  }
  0x25   :  { %69 = dma.hbm_to_vmem [thread:$0]  %s1120_s5, 1024, %s64_s24, [#allocation9], %s937_s10, %s937_s10, %s938_s14  }
  0x26   :  { %s836_s21 = scalar_lea.hbm %s1115_s0, 256 }
  0x27   :  { %p837_p2 = scmp.ne.s32.totalorder %s1115_s0, %s836_s21  ;;  %p840_p3 = scmp.lt.u32.totalorder %s836_s21, %s1115_s0 }
  0x29   :  { %p842_p4 = pnand %p840_p3, %p837_p2 }
  0x2b   :  { %845 = shalt.err (!%p842_p4)
}
  0x2c   :  { %s846_s28 = scalar_lea.vmem %s24_s26, 256  ;;  %p851_p6 = scmp.lt.s32.totalorder %s24_s26, %s24_s26 }
  0x2d   :  { %p847_p5 = scmp.ne.s32.totalorder %s24_s26, %s846_s28  ;;  %p852_p7 = scmp.lt.s32.totalorder %s846_s28, %s846_s28 }
  0x2f   :  { %p853_p8 = por %p852_p7, %p851_p6 }
  0x31   :  { %p854_p9 = pnand %p853_p8, %p847_p5 }
  0x33   :  { %857 = shalt.err (!%p854_p9)
}
  0x34   :  { %29 = dma.hbm_to_vmem [thread:$0]  %s1115_s0, 256, %s24_s26, [#allocation3], %s933_s19, %s933_s19, %s934_s20  }
  0x35   :  { %s939_s29 = smov [#allocation7]   ;;  %s940_s11 = smov [#allocation10]  }
  0x36   :  { %s49_s30 = sshll.u32 %s939_s29, 4  ;;  %s77_s12 = sshll.u32 %s940_s11, 4  ;;  %s50_s30 = int_to_ptr.vmem [resolvable:$true] %s49_s30  ;;  %s78_s12 = int_to_ptr.vmem [resolvable:$true] %s77_s12 }
  0x37   :  { %s858_s15 = scalar_lea.hbm %s1118_s3, 2048 }
  0x38   :  { %p859_p10 = scmp.ne.s32.totalorder %s1118_s3, %s858_s15  ;;  %p862_p11 = scmp.lt.u32.totalorder %s858_s15, %s1118_s3 }
  0x3a   :  { %p864_p12 = pnand %p862_p11, %p859_p10 }
  0x3c   :  { %867 = shalt.err (!%p864_p12)
}
  0x3d   :  { %s868_s0 = scalar_lea.vmem %s50_s30, 2048  ;;  %p873_p0 = scmp.lt.s32.totalorder %s50_s30, %s50_s30 }
  0x3e   :  { %p869_p13 = scmp.ne.s32.totalorder %s50_s30, %s868_s0  ;;  %p874_p1 = scmp.lt.s32.totalorder %s868_s0, %s868_s0 }
  0x40   :  { %p875_p2 = por %p874_p1, %p873_p0 }
  0x42   :  { %p876_p3 = pnand %p875_p2, %p869_p13 }
  0x44   :  { %879 = shalt.err (!%p876_p3)
}
  0x45   :  { %55 = dma.hbm_to_vmem [thread:$0]  %s1118_s3, 2048, %s50_s30, [#allocation6], %s937_s10, %s937_s10, %s938_s14  }
  0x46   :  { %s880_s23 = scalar_lea.hbm %s1122_s7, 1024 }
  0x47   :  { %p881_p4 = scmp.ne.s32.totalorder %s1122_s7, %s880_s23  ;;  %p884_p5 = scmp.lt.u32.totalorder %s880_s23, %s1122_s7 }
  0x49   :  { %p886_p6 = pnand %p884_p5, %p881_p4 }
  0x4b   :  { %889 = shalt.err (!%p886_p6)
}
  0x4c   :  { %s890_s24 = scalar_lea.vmem %s78_s12, 1024  ;;  %p895_p8 = scmp.lt.s32.totalorder %s78_s12, %s78_s12 }
  0x4d   :  { %p891_p7 = scmp.ne.s32.totalorder %s78_s12, %s890_s24  ;;  %p896_p9 = scmp.lt.s32.totalorder %s890_s24, %s890_s24 }
  0x4f   :  { %p897_p10 = por %p896_p9, %p895_p8 }
  0x51   :  { %p898_p11 = pnand %p897_p10, %p891_p7 }
  0x53   :  { %901 = shalt.err (!%p898_p11)
}
  0x54   :  { %83 = dma.hbm_to_vmem [thread:$0]  %s1122_s7, 1024, %s78_s12, [#allocation9], %s937_s10, %s937_s10, %s938_s14  }
  0x55   :  { %924 = dma.done.wait [#allocation3], 256  }
  0x56   :  { %925 = vsyncadd [#allocation3], 4294967040 }
  0x57   :  { %926 = dma.done.wait [#allocation6], 2304  }
  0x58   :  { %927 = vsyncadd [#allocation6], 4294964992 }
  0x59   :  { %928 = dma.done.wait [#allocation9], 2048  }
  0x5a   :  { %929 = vsyncadd [#allocation9], 4294965248  ;;  %v941_v0 = vmov 0   ;;  %v757_v1 = vld [vmem:[#allocation5 + $0x4] ss:$8 sps:$4 sm:$0xff]   ;;  %v102_v3 = vld [vmem:[#allocation2] sm:$0xff]  ;;  %v109_v28 = vlaneseq }
  0x5b   :  { %165 = vmatprep.mubr.bf16.mxu0 %v941_v0  ;;  %v759_v2 = vld [vmem:[#allocation5] ss:$8 sps:$4 sm:$0xff]   ;;  %v103_v4 = vld [vmem:[#allocation2 + $0x8] sm:$0xff]  ;;  %133 = vmatprep.subr.bf16.mxu0 %v757_v1  ;;  %v760_v6 = vld [vmem:[#allocation7 + $0x40] sm:$0xff]   ;;  %vm129_vm0 = vcmask 130048   ;;  %v942_v23 = vmov 0.0  }
  0x5c   :  { %v104_v5 = vpack.c.bf16 %v103_v4, %v102_v3  ;;  %134 = vmatpush1.bf16.msra.mxu0 %v759_v2  ;;  %v761_v7 = vld [vmem:[#allocation7] sm:$0xff]   ;;  %664 = vmatprep.subr.bf16.mxu1 %v760_v6  ;;  %v762_v8 = vld [vmem:[#allocation7 + $0x48] sm:$0xff]   ;;  %v764_v10 = vld [vmem:[#allocation7 + $0x50] sm:$0xff]   ;;  %v110_v29 = vshrl.u32 %v109_v28, 7  ;;  %vm943_vm1 = vmmov 0   ;;  %s944_s15 = smov [#allocation11]  }
  0x5d   :  { %665 = vmatpush3.bf16.msra.mxu1 %v761_v7  ;;  %v763_v9 = vld [vmem:[#allocation7 + $0x8] sm:$0xff]   ;;  %v765_v11 = vld [vmem:[#allocation7 + $0x10] sm:$0xff]   ;;  %v766_v12 = vld [vmem:[#allocation7 + $0x58] sm:$0xff]   ;;  %704 = vmatprep.subr.bf16.mxu0 %v942_v23  ;;  %s603_s16 = sshll.u32 %s944_s15, 4  ;;  %s604_s16 = int_to_ptr.vmem [resolvable:$true] %s603_s16 }
  0x5e   :  { %666 = vmatprep.subr.bf16.mxu1 %v762_v8  ;;  %v767_v13 = vld [vmem:[#allocation7 + $0x18] sm:$0xff]   ;;  %v768_v14 = vld [vmem:[#allocation7 + $0x60] sm:$0xff]   ;;  %v770_v16 = vld [vmem:[#allocation7 + $0x68] sm:$0xff]   ;;  %v111_v30 = vsub.s32 0, %v110_v29  ;;  %v115_v32 = vsub.s32 1, %v110_v29  ;;  %p907_p13 = scmp.lt.s32.totalorder %s604_s16, %s604_s16 }
  0x5f   :  { %619 = vmatmul.mubr.msk.bf16.vlgmr.msra.gmra.mrb[0].mxu0 %vm129_vm0, %v104_v5  ;;  %v769_v15 = vld [vmem:[#allocation7 + $0x20] sm:$0xff]   ;;  %v771_v17 = vld [vmem:[#allocation7 + $0x28] sm:$0xff]   ;;  %v772_v18 = vld [vmem:[#allocation7 + $0x70] sm:$0xff]  }
  0x60   :  { %v773_v19 = vld [vmem:[#allocation7 + $0x30] sm:$0xff]   ;;  %v774_v20 = vld [vmem:[#allocation7 + $0x78] sm:$0xff]   ;;  %v776_v22 = vld [vmem:[#allocation8] sm:$0xff]   ;;  %720 = vmatprep.mubr.msk.bf16.mxu0 %vm943_vm1, %v942_v23 }
  0x61   :  { %667 = vmatpush3.bf16.msra.mxu1 %v763_v9  ;;  %v775_v21 = vld [vmem:[#allocation7 + $0x38] sm:$0xff]   ;;  %705 = vmatpush3.bf16.msra.mxu0 %v776_v22  ;;  %v777_v24 = vld [vmem:[#allocation8 + $0x8] sm:$0xff]   ;;  %v778_v25 = vld [vmem:[#allocation8 + $0x10] sm:$0xff]  }
  0x62   :  { %668 = vmatprep.subr.bf16.mxu1 %v764_v10  ;;  %706 = vmatprep.subr.bf16.mxu0 %v942_v23  ;;  %v779_v26 = vld [vmem:[#allocation8 + $0x18] sm:$0xff]   ;;  %v780_v27 = vld [vmem:[#allocation8 + $0x20] sm:$0xff]   ;;  %v781_v49 = vld [vmem:[#allocation8 + $0x28] sm:$0xff]  }
  0x63   :  { %v107_v31 = vld [vmem:[%s1117_s2] sm:$0x3]  ;;  %v782_v50 = vld [vmem:[#allocation8 + $0x30] sm:$0xff]   ;;  %v783_v51 = vld [vmem:[#allocation8 + $0x38] sm:$0xff]  }
  0x64   :  { %v112_v33 = vrot.slane %v107_v31, %v111_v30  ;;  %v116_v34 = vrot.slane %v107_v31, %v115_v32  ;;  %v784_v52 = vld [vmem:[#allocation10] sm:$0xff]   ;;  %v785_v53 = vld [vmem:[#allocation10 + $0x8] sm:$0xff]   ;;  %v786_v54 = vld [vmem:[#allocation10 + $0x10] sm:$0xff]  }
  0x65   :  { %669 = vmatpush3.bf16.msra.mxu1 %v765_v11  ;;  %707 = vmatpush3.bf16.msra.mxu0 %v777_v24  ;;  %v787_v55 = vld [vmem:[#allocation10 + $0x18] sm:$0xff]   ;;  %v788_v56 = vld [vmem:[#allocation10 + $0x20] sm:$0xff]   ;;  %v789_v57 = vld [vmem:[#allocation10 + $0x28] sm:$0xff]  }
  0x66   :  { %670 = vmatprep.subr.bf16.mxu1 %v766_v12  ;;  %708 = vmatprep.subr.bf16.mxu0 %v942_v23  ;;  %v620_v59 = vld [vmem:[%s1119_s4] ss:$0 sm:$0xff]  ;;  %v790_v6 = vld [vmem:[#allocation10 + $0x30] sm:$0xff]   ;;  %v791_v7 = vld [vmem:[#allocation10 + $0x38] sm:$0xff]  }
  0x67   :  { %v637_v8 = vld [vmem:[%s1121_s6] ss:$0 sm:$0xff]  ;;  %s902_s6 = scalar_lea.vmem %s604_s16, 128 }
  0x68   :  { %p903_p12 = scmp.ne.s32.totalorder %s604_s16, %s902_s6  ;;  %p908_p0 = scmp.lt.s32.totalorder %s902_s6, %s902_s6 }
  0x69   :  { %671 = vmatpush3.bf16.msra.mxu1 %v767_v13  ;;  %709 = vmatpush3.bf16.msra.mxu0 %v778_v25 }
  0x6a   :  { %672 = vmatprep.subr.bf16.mxu1 %v768_v14  ;;  %710 = vmatprep.subr.bf16.mxu0 %v942_v23  ;;  %p909_p1 = por %p908_p0, %p907_p13 }
  0x6c   :  { %p910_p2 = pnand %p909_p1, %p903_p12 }
  0x6d   :  { %673 = vmatpush3.bf16.msra.mxu1 %v769_v15  ;;  %711 = vmatpush3.bf16.msra.mxu0 %v779_v26 }
  0x6e   :  { %674 = vmatprep.subr.bf16.mxu1 %v770_v16  ;;  %712 = vmatprep.subr.bf16.mxu0 %v942_v23 }
  0x71   :  { %675 = vmatpush3.bf16.msra.mxu1 %v771_v17  ;;  %713 = vmatpush3.bf16.msra.mxu0 %v780_v27 }
  0x72   :  { %676 = vmatprep.subr.bf16.mxu1 %v772_v18  ;;  %714 = vmatprep.subr.bf16.mxu0 %v942_v23  ;;  %v646_v18 = vld [vmem:[%s1123_s8] ss:$0 sm:$0xff] }
  0x75   :  { %677 = vmatpush3.bf16.msra.mxu1 %v773_v19  ;;  %715 = vmatpush3.bf16.msra.mxu0 %v781_v49 }
  0x76   :  { %678 = vmatprep.subr.bf16.mxu1 %v774_v20  ;;  %716 = vmatprep.subr.bf16.mxu0 %v942_v23 }
  0x79   :  { %679 = vmatpush3.bf16.msra.mxu1 %v775_v21  ;;  %717 = vmatpush3.bf16.msra.mxu0 %v782_v50 }
  0x7a   :  { %724 = vmatprep.subr.bf16.mxu1 %v942_v23  ;;  %718 = vmatprep.subr.bf16.mxu0 %v942_v23 }
  0x7d   :  { %719 = vmatpush3.bf16.msra.mxu0 %v783_v51 }
 0x132   :  { %v167_v35 = vpop.f32.mrb[0].mxu0 }
 0x133   :  { %v168_v36 = vadd.f32 %v167_v35, %v112_v33  ;;  %v169_v37 = vpop.f32.mrb[1].mxu0 }
 0x134   :  { %v170_v38 = vadd.f32 %v169_v37, %v116_v34  ;;  %v171_v39 = vpop.f32.mrb[2].mxu0 }
 0x135   :  { %v172_v40 = vadd.f32 %v171_v39, %v112_v33  ;;  %v173_v41 = vpop.f32.mrb[3].mxu0  ;;  %v176_v43 = vmax.f32 %v168_v36, 0.0 }
 0x136   :  { %v174_v42 = vadd.f32 %v173_v41, %v116_v34  ;;  %v177_v45 = vmax.f32 %v170_v38, 0.0 }
 0x137   :  { %v178_v44 = vmax.f32 %v172_v40, 0.0 }
 0x138   :  { %v179_v46 = vmax.f32 %v174_v42, 0.0 }
 0x139   :  { %v180_v47 = vpack.c.bf16 %v178_v44, %v176_v43 }
 0x13a   :  { %v181_v48 = vpack.c.bf16 %v179_v46, %v177_v45 }
 0x13c   :  { %349 = vmatprep.mubr.bf16.mxu1 %v181_v48 }
 0x13d   :  { %350 = vmatmul.mubr.bf16.vlgmr.msra.gmra.mrb[0].mxu1 %v180_v47 }
 0x13e   :  { %740 = vmatprep.mubr.msk.bf16.mxu1 %vm943_vm1, %v942_v23  ;;  %725 = vmatpush3.bf16.msra.mxu1 %v784_v52 }
 0x13f   :  { %726 = vmatprep.subr.bf16.mxu1 %v942_v23 }
 0x142   :  { %727 = vmatpush3.bf16.msra.mxu1 %v785_v53 }
 0x143   :  { %728 = vmatprep.subr.bf16.mxu1 %v942_v23 }
 0x146   :  { %729 = vmatpush3.bf16.msra.mxu1 %v786_v54 }
 0x147   :  { %730 = vmatprep.subr.bf16.mxu1 %v942_v23 }
 0x14a   :  { %731 = vmatpush3.bf16.msra.mxu1 %v787_v55 }
 0x14b   :  { %732 = vmatprep.subr.bf16.mxu1 %v942_v23 }
 0x14e   :  { %733 = vmatpush3.bf16.msra.mxu1 %v788_v56 }
 0x14f   :  { %734 = vmatprep.subr.bf16.mxu1 %v942_v23 }
 0x152   :  { %735 = vmatpush3.bf16.msra.mxu1 %v789_v57 }
 0x153   :  { %736 = vmatprep.subr.bf16.mxu1 %v942_v23 }
 0x156   :  { %737 = vmatpush3.bf16.msra.mxu1 %v790_v6 }
 0x157   :  { %738 = vmatprep.subr.bf16.mxu1 %v942_v23 }
 0x15a   :  { %739 = vmatpush3.bf16.msra.mxu1 %v791_v7 }
 0x210   :  { %v680_v58 = vpop.f32.mrb[0].mxu1 }
 0x211   :  { %v681_v60 = vpop.f32.mrb[1].mxu1 }
 0x212   :  { %v682_v61 = vadd.f32 %v681_v60, %v680_v58  ;;  %v683_v62 = vpop.f32.mrb[2].mxu1 }
 0x213   :  { %v684_v63 = vpop.f32.mrb[3].mxu1 }
 0x214   :  { %v352_v0 = vadd.f32 %v682_v61, %v620_v59  ;;  %v685_v1 = vadd.f32 %v684_v63, %v683_v62 }
 0x216   :  { %v355_v2 = vadd.f32 %v685_v1, %v620_v59  ;;  %v358_v3 = vmax.f32 %v352_v0, 0.0 }
 0x218   :  { %v359_v4 = vmax.f32 %v355_v2, 0.0 }
 0x21a   :  { %v360_v5 = vpack.c.bf16 %v359_v4, %v358_v3 }
 0x21c   :  { %721 = vmatmul.mubr.bf16.vlgmr.msra.gmra.mrb[4].mxu0 %v360_v5 }
 0x2ef   :  { %v466_v9 = vpop.f32.mrb[4].mxu0 }
 0x2f0   :  { %v467_v10 = vadd.f32 %v637_v8, %v466_v9  ;;  %v722_v11 = vpop.f32.mrb[5].mxu0 }
 0x2f1   :  { %v469_v12 = vpop.f32.mrb[6].mxu0 }
 0x2f2   :  { %v470_v13 = vadd.f32 %v637_v8, %v469_v12  ;;  %v723_v14 = vpop.f32.mrb[7].mxu0  ;;  %v473_v15 = vmax.f32 %v467_v10, 0.0 }
 0x2f4   :  { %v474_v16 = vmax.f32 %v470_v13, 0.0 }
 0x2f6   :  { %v475_v17 = vpack.c.bf16 %v474_v16, %v473_v15 }
 0x2f8   :  { %741 = vmatmul.mubr.bf16.vlgmr.msra.gmra.mrb[4].mxu1 %v475_v17 }
 0x3cb   :  { %v581_v19 = vpop.f32.mrb[4].mxu1 }
 0x3cc   :  { %v742_v20 = vpop.f32.mrb[5].mxu1  ;;  %v582_v22 = vadd.f32 %v646_v18, %v581_v19 }
 0x3cd   :  { %v584_v21 = vpop.f32.mrb[6].mxu1 }
 0x3ce   :  { %v585_v23 = vadd.f32 %v646_v18, %v584_v21  ;;  %v743_v24 = vpop.f32.mrb[7].mxu1 }
 0x3d0   :  { %v662_v25 = vpack.c.bf16 %v585_v23, %v582_v22 }
 0x3d2   :  { %663 = vst [vmem:[#allocation11] sm:$0xff] %v662_v25  }
 0x3d3   :  { %913 = shalt.err (!%p910_p2)
}
 0x3d4   :  { %s914_s18 = scalar_lea.hbm %s1124_s9, 128 }
 0x3d5   :  { %p915_p3 = scmp.ne.s32.totalorder %s1124_s9, %s914_s18  ;;  %p918_p4 = scmp.lt.u32.totalorder %s914_s18, %s1124_s9 }
 0x3d7   :  { %p920_p5 = pnand %p918_p4, %p915_p3 }
 0x3d9   :  { %923 = shalt.err (!%p920_p5)
}
 0x3da   :  { %609 = dma.vmem_to_hbm [thread:$0]  %s604_s16, 128, %s1124_s9, [#allocation4], %s937_s10, %s937_s10, %s938_s14  }
 0x3db   :  { %930 = dma.done.wait [#allocation4], 128  }
 0x3dc   :  { %931 = vsyncadd [#allocation4], 4294967168 }
 0x3dd   :  { %613 = vsyncpa [#allocation3], 1 }
 0x3de   :  { %614 = vsyncpa [#allocation6], 1 }
 0x3df   :  { %615 = vsyncpa [#allocation9], 1 }
 0x3e0   :  { %616 = vsyncpa [#allocation4], 1 }

</bundles_post_ra>
